<compile_context>
chip_gen: v6e
topology: v6e:2x2x1
jax: 0.10.0
libtpu: 0.0.40
codegen_flags: <defaults>
</compile_context>

<pallas_src>
import functools
import math

import jax
import jax.numpy as jnp
from jax import lax
from jax.experimental import pallas as pl
from jax.experimental.pallas import tpu as pltpu

LANE = 128  # TPU lane width


# ---------------------------------------------------------------------------
# Buffer construction (mirrors PositionalEncoding.__init__)
# ---------------------------------------------------------------------------
def make_positional_encoding_table(d_model: int, max_len: int) -> jnp.ndarray:
    """Returns pe with shape [max_len, d_model] (the torch buffer squeezed on axis 1)."""
    position = jnp.arange(max_len, dtype=jnp.float32)[:, None]            # [L, 1]
    div_term = jnp.exp(
        jnp.arange(0, d_model, 2, dtype=jnp.float32) * (-math.log(10000.0) / d_model)
    )
    sin_part = jnp.sin(position * div_term)
    cos_part = jnp.cos(position * div_term)
    if d_model % 2 != 0:
        cos_part = cos_part[:, : d_model // 2]
    pe = jnp.zeros((max_len, d_model), dtype=jnp.float32)
    pe = pe.at[:, 0::2].set(sin_part)
    pe = pe.at[:, 1::2].set(cos_part)
    return pe


# ---------------------------------------------------------------------------
# Counter-based PRNG (portable: plain integer VPU ops, no pltpu.prng_*)
# ---------------------------------------------------------------------------
def _mix32(x):
    """splitmix32 finalizer on uint32 arrays."""
    x = x ^ (x >> 16)
    x = x * jnp.uint32(0x7FEB352D)
    x = x ^ (x >> 15)
    x = x * jnp.uint32(0x846CA68B)
    x = x ^ (x >> 16)
    return x


def _mix32_py(x: int) -> int:
    x &= 0xFFFFFFFF
    x ^= x >> 16
    x = (x * 0x7FEB352D) & 0xFFFFFFFF
    x ^= x >> 15
    x = (x * 0x846CA68B) & 0xFFFFFFFF
    x ^= x >> 16
    return x


# ---------------------------------------------------------------------------
# Pallas kernels
# ---------------------------------------------------------------------------
def _pe_add_kernel(x_ref, pe_ref, o_ref):
    # x_ref / o_ref: (bb, ts, lane) VMEM tiles; pe_ref: (ts, lane), broadcast over batch.
    o_ref[...] = x_ref[...] + pe_ref[...].astype(x_ref.dtype)


def _pe_add_dropout_kernel(x_ref, pe_ref, o_ref, *, p, seed_mix, bb, ts, lane, total_rows):
    # Fused add + dropout using a counter-based hash of the global element index.
    # TODO(synk): stream does not bitwise-match torch.nn.Dropout's RNG; the
    #             statistics (keep prob 1-p, 1/(1-p) scaling) match exactly.
    shape = x_ref.shape                                   # (bb, ts, lane)
    b0 = (pl.program_id(1) * bb).astype(jnp.uint32)       # batch-tile base (innermost axis)
    s0 = (pl.program_id(0) * ts).astype(jnp.uint32)       # row-tile base
    bi = lax.broadcasted_iota(jnp.int32, shape, 0).astype(jnp.uint32) + b0
    ri = lax.broadcasted_iota(jnp.int32, shape, 1).astype(jnp.uint32) + s0
    li = lax.broadcasted_iota(jnp.int32, shape, 2).astype(jnp.uint32)
    idx = (bi * jnp.uint32(total_rows) + ri) * jnp.uint32(lane) + li
    bits = _mix32(_mix32(idx ^ jnp.uint32(seed_mix)))
    # Top 24 bits -> uniform in [0, 1); keep with probability 1 - p.
    u = (bits >> 8).astype(jnp.int32).astype(jnp.float32) * jnp.float32(1.0 / (1 << 24))
    keep = u >= jnp.float32(p)
    # Math stays in x.dtype (bf16 stays bf16 on v6e/v7x; f32 inputs unchanged).
    y = x_ref[...] + pe_ref[...].astype(x_ref.dtype)
    scale = jnp.asarray(1.0 / (1.0 - p), dtype=x_ref.dtype)
    o_ref[...] = jnp.where(keep, y * scale, jnp.zeros_like(y))


# ---------------------------------------------------------------------------
# Tiling helpers
# ---------------------------------------------------------------------------
def _choose_tiles(batch, rows, lane, itemsize, target_bytes):
    """Pick (bb, ts): batch-fold factor and row-tile size (~target_bytes per x block)."""
    plane_bytes = rows * lane * itemsize
    if plane_bytes >= target_bytes and rows > 8:
        bb = 1
        ts = max(8, (target_bytes // (lane * itemsize)) // 8 * 8)
        ts = min(ts, rows)                       # multiple of 8 when < rows
    else:
        ts = rows                                # full per-batch plane in one block
        bb = max(1, min(batch, target_bytes // max(plane_bytes, 1)))
    return bb, ts


# ---------------------------------------------------------------------------
# Wrapper (forward pass)
# ---------------------------------------------------------------------------
def positional_encoding_forward(x, pe, *, p: float = 0.1, training: bool = False,
                                seed: int = 0, row_tile_bytes: int | None = None):
    """x: [B, S, D]; pe: [max_len, D] float32 table."""
    assert x.ndim == 3, f"Input must be 3D (B, S, D), got {x.shape}"
    B, S, D = x.shape
    max_len, d_model = pe.shape
    assert D == d_model, f"embedding dim {D} != d_model {d_model}"
    assert S <= max_len, f"seq len {S} exceeds max_len {max_len}"

    dropout_active = bool(training) and float(p) > 0.0
    if dropout_active and p >= 1.0:
        # torch.nn.Dropout(p=1.0) zeroes the whole tensor; avoid 1/(1-p) overflow.
        return jnp.zeros_like(x)

    # Lane-dense packing: make the last dim a multiple of 128 whenever possible.
    if D % LANE == 0:
        x_w, pe_w, rows, lane = x, pe, S, D
    elif (S * D) % LANE == 0:
        rows, lane = (S * D) // LANE, LANE
        x_w = x.reshape(B, rows, lane)
        if (max_len * D) % LANE == 0:
            pe_w = pe.reshape((max_len * D) // LANE, LANE)   # contiguous: metadata-only
        else:
            pe_w = pe[:S].reshape(rows, lane)
    else:
        # TODO(synk): masked-store fallback when S*D is not a multiple of 128.
        x_w, pe_w, rows, lane = x, pe, S, D

    itemsize = jnp.dtype(x.dtype).itemsize
    if row_tile_bytes is None:
        # Smaller tiles on the dropout path: its uint32/f32 intermediates roughly
        # double the per-block working set; keeps v5e's 16 MiB scoped VMEM happy.
        # (On v7x, ~4 MiB tiles can be passed explicitly for fewer grid steps.)
        row_tile_bytes = (1 << 20) if dropout_active else (2 << 20)
    bb, ts = _choose_tiles(B, rows, lane, itemsize, row_tile_bytes)

    # (8,128) tiling rule: if the row tile equals the full x extent but is not a
    # multiple of 8, trim pe so its block is full-extent too (tiny, cheap slice).
    if ts == rows and ts % 8 != 0 and pe_w.shape[0] != ts:
        pe_w = pe_w[:ts]

    n_row_tiles = pl.cdiv(rows, ts)
    n_batch_tiles = pl.cdiv(B, bb)

    out_shape = jax.ShapeDtypeStruct((B, rows, lane), x.dtype)
    # Batch axis innermost + "arbitrary": pe's block index (s, 0) is constant
    # across consecutive steps, so its tile is DMA'd once per row tile instead
    # of once per (batch, row tile).  Row axis "parallel" for megacore sharding.
    cparams = pltpu.CompilerParams(dimension_semantics=("parallel", "arbitrary"))

    in_specs = [
        pl.BlockSpec((bb, ts, lane), lambda s, b: (b, s, 0)),
        pl.BlockSpec((ts, lane), lambda s, b: (s, 0)),
    ]
    out_spec = pl.BlockSpec((bb, ts, lane), lambda s, b: (b, s, 0))

    if not dropout_active:
        kernel = _pe_add_kernel
    else:
        kernel = functools.partial(
            _pe_add_dropout_kernel, p=float(p), seed_mix=_mix32_py(int(seed)),
            bb=bb, ts=ts, lane=lane, total_rows=rows)

    out = pl.pallas_call(
        kernel,
        out_shape=out_shape,
        grid=(n_row_tiles, n_batch_tiles),
        in_specs=in_specs,
        out_specs=out_spec,
        compiler_params=cparams,
        input_output_aliases={0: 0},             # output reuses x's HBM buffer
    )(x_w, pe_w)

    return out.reshape(B, S, D) if out.shape != (B, S, D) else out


# ---------------------------------------------------------------------------
# Main
# ---------------------------------------------------------------------------
if __name__ == "__main__":
    key = jax.random.PRNGKey(0)
    k1, k2 = jax.random.split(key)

    # --- small demo shapes (module contract: [B, S, D]) --------------------
    B, S, D = 2, 8, 32
    MAX_LEN = 64
    x = jax.random.normal(k1, (B, S, D), dtype=jnp.float32)
    pe = make_positional_encoding_table(d_model=D, max_len=MAX_LEN)
    ref = x + pe[:S][None, :, :]

    # Eval mode (dropout identity).
    out = jax.block_until_ready(positional_encoding_forward(x, pe, p=0.1, training=False))
    assert out.shape == (B, S, D) and out.dtype == x.dtype
    assert jnp.allclose(out, ref, atol=1e-6, rtol=1e-6), "eval kernel mismatch"

    # Training mode: every element must be 0 (dropped) or (x+pe)/(1-p) (kept).
    p_drop = 0.25
    out_tr = jax.block_until_ready(
        positional_encoding_forward(x, pe, p=p_drop, training=True, seed=1234))
    scaled = ref / (1.0 - p_drop)
    ok = jnp.isclose(out_tr, 0.0, atol=1e-6) | jnp.isclose(out_tr, scaled, rtol=1e-5, atol=1e-5)
    assert out_tr.shape == (B, S, D) and bool(jnp.all(ok)), "training kernel mismatch"
    drop_frac = float(jnp.mean(jnp.isclose(out_tr, 0.0, atol=1e-6).astype(jnp.float32)))
    assert 0.05 < drop_frac < 0.60, f"dropout fraction {drop_frac} far from p={p_drop}"

    # --- second config exercising the row-tiled grid (partial last tile) ---
    B2, S2, D2 = 2, 44, 128                    # D2 lane-dense; 44 rows -> 6 tiles of 8
    x2 = jax.random.normal(k2, (B2, S2, D2), dtype=jnp.float32)
    pe2 = make_positional_encoding_table(d_model=D2, max_len=64)
    ref2 = x2 + pe2[:S2][None, :, :]

    out2 = jax.block_until_ready(
        positional_encoding_forward(x2, pe2, training=False, row_tile_bytes=4096))
    assert jnp.allclose(out2, ref2, atol=1e-6, rtol=1e-6), "tiled eval kernel mismatch"

    out2_tr = jax.block_until_ready(
        positional_encoding_forward(x2, pe2, p=p_drop, training=True, seed=7,
                                    row_tile_bytes=4096))
    scaled2 = ref2 / (1.0 - p_drop)
    ok2 = jnp.isclose(out2_tr, 0.0, atol=1e-6) | jnp.isclose(out2_tr, scaled2, rtol=1e-5, atol=1e-5)
    assert bool(jnp.all(ok2)), "tiled training kernel mismatch"

    print("KERNEL_OK")
</pallas_src>

<mosaic_0001>
module attributes {stable_mosaic.version = 11 : i64} {
  func.func @_pe_add_kernel(%arg0: i32, %arg1: i32, %arg2: memref<2x2x128xf32, #tpu.memory_space<vmem>>, %arg3: memref<2x128xf32, #tpu.memory_space<vmem>>, %arg4: memref<2x2x128xf32, #tpu.memory_space<vmem>>) attributes {dimension_semantics = [#tpu.dimension_semantics<parallel>, #tpu.dimension_semantics<arbitrary>], iteration_bounds = array<i64: 1, 1>, scalar_prefetch = 0 : i64, scratch_operands = 0 : i64, tpu.core_type = #tpu.core_type<tc>, window_params = [{transform_indices = @transform_0, window_bounds = array<i64: 2, 2, 128>}, {transform_indices = @transform_1, window_bounds = array<i64: 2, 128>}, {transform_indices = @transform_2, window_bounds = array<i64: 2, 2, 128>}]} {
    %c0 = arith.constant 0 : index
    %c0_0 = arith.constant 0 : index
    %c0_1 = arith.constant 0 : index
    %0 = vector.load %arg2[%c0, %c0_0, %c0_1] : memref<2x2x128xf32, #tpu.memory_space<vmem>>, vector<2x2x128xf32>
    %c0_2 = arith.constant 0 : index
    %c0_3 = arith.constant 0 : index
    %1 = vector.load %arg3[%c0_2, %c0_3] : memref<2x128xf32, #tpu.memory_space<vmem>>, vector<2x128xf32>
    %2 = vector.shape_cast %1 : vector<2x128xf32> to vector<1x2x128xf32>
    %3 = vector.broadcast %2 : vector<1x2x128xf32> to vector<2x2x128xf32>
    %4 = arith.addf %0, %3 : vector<2x2x128xf32>
    %c0_4 = arith.constant 0 : index
    %c0_5 = arith.constant 0 : index
    %c0_6 = arith.constant 0 : index
    %5 = vector.load %arg4[%c0_4, %c0_5, %c0_6] : memref<2x2x128xf32, #tpu.memory_space<vmem>>, vector<2x2x128xf32>
    tpu.vector_store %arg4[%c0_4, %c0_5, %c0_6], %4 {strides = array<i32>} : memref<2x2x128xf32, #tpu.memory_space<vmem>>, vector<2x2x128xf32>,
    return
  }
  func.func @transform_0(%arg0: i32, %arg1: i32) -> (i32, i32, i32) {
    %c0_i32 = arith.constant 0 : i32
    %c0_i32_0 = arith.constant 0 : i32
    return %arg1, %arg0, %c0_i32 : i32, i32, i32
  }
  func.func @transform_1(%arg0: i32, %arg1: i32) -> (i32, i32) {
    %c0_i32 = arith.constant 0 : i32
    %c0_i32_0 = arith.constant 0 : i32
    return %arg0, %c0_i32 : i32, i32
  }
  func.func @transform_2(%arg0: i32, %arg1: i32) -> (i32, i32, i32) {
    %c0_i32 = arith.constant 0 : i32
    %c0_i32_0 = arith.constant 0 : i32
    return %arg1, %arg0, %c0_i32 : i32, i32, i32
  }
}

</mosaic_0001>

<bundles_post_ra>
// kernel: tpu_custom_call.1
= control target key start
LH: loop header
LB: loop body
LE: loop exit
PB: predicated region body
PF: predicated region fallthrough
CT: control target
= control target key end

     0   :  { %7 = vsyncpa [#allocation3], 0  ;;  %s126_s0 = inlined_call_operand.hbm [shape: f32[2,2,128], index: 0, kind: input, shape index: {}, may-alias: {0,2}]   ;;  %s127_s1 = inlined_call_operand.vmem [shape: f32[2,128], index: 1, kind: input, shape index: {}]   ;;  %s128_s2 = inlined_call_operand.hbm [shape: f32[2,2,128], index: 2, kind: output, shape index: {}, may-alias: {0,2}]  }
   0x1   :  { %8 = vsyncpa [#allocation4], 0  ;;  %s98_s9 = smov [#allocation2]  }
   0x2   :  { %s14_s10 = sshll.u32 %s98_s9, 4  ;;  %s15_s10 = int_to_ptr.vmem [resolvable:$true] %s14_s10 }
   0x3   :  { %s62_s11 = scalar_lea.vmem %s15_s10, 64  ;;  %p67_p1 = scmp.lt.s32.totalorder %s15_s10, %s15_s10 }
   0x4   :  { %p63_p0 = scmp.ne.s32.totalorder %s15_s10, %s62_s11  ;;  %p68_p2 = scmp.lt.s32.totalorder %s62_s11, %s62_s11 }
   0x6   :  { %p69_p3 = por %p68_p2, %p67_p1 }
   0x8   :  { %p70_p4 = pnand %p69_p3, %p63_p0 }
   0xa   :  { %73 = shalt.err (!%p70_p4)
}
   0xb   :  { %s99_s12 = smov 32   ;;  %s100_s13 = smov 2  }
   0xc   :  { %20 = dma.hbm_to_vmem [thread:$0]  %s126_s0, 64, %s15_s10, [#allocation3], %s99_s12, %s99_s12, %s100_s13  }
   0xd   :  { %94 = dma.done.wait [#allocation3], 64  }
   0xe   :  { %95 = vsyncadd [#allocation3], 4294967232  ;;  %s101_s16 = smov [#allocation5]   ;;  %v26_v0 = vld [vmem:[#allocation2] sm:$0x3] }
   0xf   :  { %s38_s17 = sshll.u32 %s101_s16, 4  ;;  %v28_v1 = vld [vmem:[%s127_s1] sm:$0x3]  ;;  %v27_v2 = vld [vmem:[#allocation2 + $0x2] sm:$0x3]  ;;  %s39_s17 = int_to_ptr.vmem [resolvable:$true] %s38_s17 }
  0x10   :  { %v29_v3 = vadd.f32 %v28_v1, %v26_v0  ;;  %v30_v4 = vadd.f32 %v28_v1, %v27_v2  ;;  %s74_s20 = scalar_lea.vmem %s39_s17, 64  ;;  %p79_p6 = scmp.lt.s32.totalorder %s39_s17, %s39_s17 }
  0x11   :  { %p75_p5 = scmp.ne.s32.totalorder %s39_s17, %s74_s20  ;;  %p80_p7 = scmp.lt.s32.totalorder %s74_s20, %s74_s20 }
  0x12   :  { %31 = vst [vmem:[#allocation5] sm:$0x3] %v29_v3  ;;  %32 = vst [vmem:[#allocation5 + $0x2] sm:$0x3] %v30_v4 }
  0x13   :  { %p81_p8 = por %p80_p7, %p79_p6 }
  0x15   :  { %p82_p9 = pnand %p81_p8, %p75_p5 }
  0x17   :  { %85 = shalt.err (!%p82_p9)
}
  0x18   :  { %44 = dma.vmem_to_hbm [thread:$0]  %s39_s17, 64, %s128_s2, [#allocation4], %s99_s12, %s99_s12, %s100_s13  }
  0x19   :  { %96 = dma.done.wait [#allocation4], 64  }
  0x1a   :  { %97 = vsyncadd [#allocation4], 4294967232 }
  0x1b   :  { %48 = vsyncpa [#allocation3], 1 }
  0x1c   :  { %49 = vsyncpa [#allocation4], 1 }

</bundles_post_ra>
